<compile_context>
chip_gen: v6e
topology: v6e:2x2x1
jax: 0.10.0
libtpu: 0.0.40
codegen_flags: <defaults>
</compile_context>

<pallas_src>
import jax
import jax.numpy as jnp
from jax.experimental import pallas as pl
from jax.experimental.pallas import tpu as pltpu


def _ffattn_kernel(keys_ref, bias_ref, w_ref, b_ref, wctx_ref, probs_ref):
    keys = keys_ref[...].astype(jnp.float32)                 # [TB, T, D]
    w_eff = w_ref[...].astype(jnp.float32)                   # [1, D]

    # Folded 2-layer scorer (eval mode): scores = keys . w_eff + b_eff
    # Pure VPU multiply + lane reduce — no MXU, no reshapes.
    scores = jnp.sum(keys * w_eff[None, :, :], axis=-1) + b_ref[0, 0]   # [TB, T]

    # masked_fill(mask.bool(), -inf), pre-folded into an additive 0/-inf bias.
    scores = scores + bias_ref[...]

    # softmax over T (nn.Softmax() on 2-D input -> dim=1); exact divide for
    # numerical parity with torch.softmax.
    m = jnp.max(scores, axis=-1, keepdims=True)
    e = jnp.exp(scores - m)
    probs = e / jnp.sum(e, axis=-1, keepdims=True)           # [TB, T]

    # weighted_context = bmm(probs, keys): broadcast multiply + sublane reduce.
    wctx = jnp.sum(probs[:, :, None] * keys, axis=1)         # [TB, D]

    wctx_ref[...] = wctx.astype(wctx_ref.dtype)
    probs_ref[...] = probs.astype(probs_ref.dtype)


def _pick_block_b(B, T, D, itemsize):
    """>= 4 grid steps when possible, block_b % 8 == 0, keys tile in VMEM budget."""
    vmem_budget = 8 << 20  # conservative vs 16/32 MiB scoped limits (v5e/v6e/v7x)
    for cand in (B // 4, 256, 128, 64, 32, 16, 8):
        if (cand >= 8 and cand % 8 == 0 and B % cand == 0
                and 2 * cand * T * D * itemsize <= vmem_budget):
            return cand
    return B


def feed_forward_attention(query, keys, mask, params, *, block_b=None):
    """Pallas forward of FeedForwardAttention (eval mode).

    query : unused by the reference forward (kept for signature parity)
    keys  : [B, T, D]
    mask  : [B, T]   nonzero -> position masked to -inf before the softmax
    params: w1 [Hd, D], b1 [Hd], w2 [1, Hd], b2 [1]  (PyTorch nn.Linear layout)
    Returns (weighted_context [B, D], None, probs [B, 1, T]).
    """
    del query  # dead input in the PyTorch forward
    B, T, D = keys.shape
    w1, b1, w2, b2 = params["w1"], params["b1"], params["w2"], params["b2"]

    # Fold the two scorer Linears (no nonlinearity, dropout = identity).
    w_eff = (w2.astype(jnp.float32) @ w1.astype(jnp.float32)).reshape(1, D)      # [1, D]
    b_eff = (w2.astype(jnp.float32) @ b1.astype(jnp.float32)
             + b2.astype(jnp.float32)).reshape(1, 1)                             # [1, 1]

    # Pre-fold the boolean mask into an additive 0 / -inf bias.
    mask_bias = jnp.where(mask != 0, -jnp.inf, 0.0).astype(jnp.float32)          # [B, T]

    if block_b is None:
        block_b = _pick_block_b(B, T, D, jnp.dtype(keys.dtype).itemsize)
    assert B % block_b == 0 and (block_b == B or block_b % 8 == 0)
    num_tiles = B // block_b

    const2d = lambda i: (0, 0)

    cost = pl.CostEstimate(
        flops=4 * B * T * D + 4 * B * T,
        transcendentals=B * T,
        bytes_accessed=4 * (B * T * D + 2 * B * T + D + 1 + B * D),
    )

    wctx, probs = pl.pallas_call(
        _ffattn_kernel,
        out_shape=(
            jax.ShapeDtypeStruct((B, D), jnp.float32),   # weighted_context
            jax.ShapeDtypeStruct((B, T), jnp.float32),   # attention probs
        ),
        grid_spec=pltpu.PrefetchScalarGridSpec(
            num_scalar_prefetch=0,
            grid=(num_tiles,),
            in_specs=[
                pl.BlockSpec((block_b, T, D), lambda i: (i, 0, 0)),   # keys tile
                pl.BlockSpec((block_b, T), lambda i: (i, 0)),         # mask bias tile
                pl.BlockSpec((1, D), const2d),                        # folded weight
                pl.BlockSpec((1, 1), const2d),                        # folded bias
            ],
            out_specs=[
                pl.BlockSpec((block_b, D), lambda i: (i, 0)),
                pl.BlockSpec((block_b, T), lambda i: (i, 0)),
            ],
        ),
        compiler_params=pltpu.CompilerParams(
            dimension_semantics=("parallel",)),
        cost_estimate=cost,
    )(keys, mask_bias, w_eff, b_eff)

    return wctx, None, probs.reshape(B, 1, T)


def feed_forward_attention_ref(query, keys, mask, params):
    """Pure-JAX reference mirroring the PyTorch forward (unfolded 2-layer scorer)."""
    del query
    B, T, _ = keys.shape
    h = jnp.einsum("btd,hd->bth", keys, params["w1"]) + params["b1"]
    scores = jnp.einsum("bth,oh->bto", h, params["w2"])[..., 0] + params["b2"][0]
    scores = jnp.where(mask != 0, -jnp.inf, scores)
    probs = jax.nn.softmax(scores, axis=-1)
    wctx = jnp.einsum("bt,btd->bd", probs, keys)
    return wctx, None, probs.reshape(B, 1, T)


if __name__ == "__main__":
    # small shapes: batch=32 (tiled 8 per grid step -> 4 grid steps), seq=8,
    # input_dim=32, scorer hidden_dim=32, scorer layers=2
    B, T, D, Hd = 32, 8, 32, 32
    key = jax.random.PRNGKey(0)
    k1, k2, k3, k4, k5, k6 = jax.random.split(key, 6)

    keys = jax.random.normal(k1, (B, T, D), dtype=jnp.float32)
    query = jax.random.normal(k2, (B, D), dtype=jnp.float32)   # unused by forward

    # padding-style mask: positions >= length are masked (never masks a whole row)
    lengths = jax.random.randint(k3, (B,), 3, T + 1)
    mask = (jnp.arange(T)[None, :] >= lengths[:, None]).astype(jnp.float32)

    # PyTorch nn.Linear parameter shapes: weight [out, in], bias [out]
    params = {
        "w1": jax.random.normal(k4, (Hd, D), dtype=jnp.float32) * 0.1,   # Linear(D, Hd)
        "b1": jax.random.normal(k5, (Hd,), dtype=jnp.float32) * 0.1,
        "w2": jax.random.normal(k6, (1, Hd), dtype=jnp.float32) * 0.1,   # Linear(Hd, 1)
        "b2": jnp.full((1,), 0.05, dtype=jnp.float32),
    }

    wctx, none_out, probs = feed_forward_attention(query, keys, mask, params)
    jax.block_until_ready((wctx, probs))

    wctx_r, _, probs_r = feed_forward_attention_ref(query, keys, mask, params)
    assert none_out is None
    assert jnp.allclose(wctx, wctx_r, atol=1e-3, rtol=1e-3), \
        float(jnp.max(jnp.abs(wctx - wctx_r)))
    assert jnp.allclose(probs, probs_r, atol=1e-3, rtol=1e-3), \
        float(jnp.max(jnp.abs(probs - probs_r)))

    print("KERNEL_OK")
</pallas_src>

<mosaic_0001>
module attributes {stable_mosaic.version = 11 : i64} {
  func.func @_ffattn_kernel(%arg0: i32, %arg1: memref<8x8x32xf32, #tpu.memory_space<vmem>>, %arg2: memref<8x8xf32, #tpu.memory_space<vmem>>, %arg3: memref<1x32xf32, #tpu.memory_space<vmem>>, %arg4: memref<1x1xf32, #tpu.memory_space<vmem>>, %arg5: memref<8x32xf32, #tpu.memory_space<vmem>>, %arg6: memref<8x8xf32, #tpu.memory_space<vmem>>) attributes {dimension_semantics = [#tpu.dimension_semantics<parallel>], iteration_bounds = array<i64: 4>, scalar_prefetch = 0 : i64, scratch_operands = 0 : i64, tpu.core_type = #tpu.core_type<tc>, window_params = [{transform_indices = @transform_0, window_bounds = array<i64: 8, 8, 32>}, {transform_indices = @transform_1, window_bounds = array<i64: 8, 8>}, {pipeline_mode = #tpu.pipeline_mode<synchronous>, transform_indices = @transform_2, window_bounds = array<i64: 1, 32>}, {pipeline_mode = #tpu.pipeline_mode<synchronous>, transform_indices = @transform_3, window_bounds = array<i64: 1, 1>}, {transform_indices = @transform_4, window_bounds = array<i64: 8, 32>}, {transform_indices = @transform_5, window_bounds = array<i64: 8, 8>}]} {
    %c0 = arith.constant 0 : index
    %c0_0 = arith.constant 0 : index
    %c0_1 = arith.constant 0 : index
    %0 = vector.load %arg1[%c0, %c0_0, %c0_1] : memref<8x8x32xf32, #tpu.memory_space<vmem>>, vector<8x8x32xf32>
    %c0_2 = arith.constant 0 : index
    %c0_3 = arith.constant 0 : index
    %1 = vector.load %arg3[%c0_2, %c0_3] : memref<1x32xf32, #tpu.memory_space<vmem>>, vector<1x32xf32>
    %2 = vector.shape_cast %1 : vector<1x32xf32> to vector<1x1x32xf32>
    %3 = vector.broadcast %2 : vector<1x1x32xf32> to vector<8x8x32xf32>
    %4 = arith.mulf %0, %3 : vector<8x8x32xf32>
    %cst = arith.constant dense<0.000000e+00> : vector<8x8xf32>
    %5 = vector.multi_reduction <add>, %4, %cst [2] : vector<8x8x32xf32> to vector<8x8xf32>
    %c0_4 = arith.constant 0 : index
    %c0_5 = arith.constant 0 : index
    %6 = vector.load %arg4[%c0_4, %c0_5] : memref<1x1xf32, #tpu.memory_space<vmem>>, vector<1x1xf32>
    %7 = vector.extract %6[0, 0] : f32 from vector<1x1xf32>
    %8 = vector.broadcast %7 : f32 to vector<8x8xf32>
    %9 = arith.addf %5, %8 : vector<8x8xf32>
    %c0_6 = arith.constant 0 : index
    %c0_7 = arith.constant 0 : index
    %10 = vector.load %arg2[%c0_6, %c0_7] : memref<8x8xf32, #tpu.memory_space<vmem>>, vector<8x8xf32>
    %11 = arith.addf %9, %10 : vector<8x8xf32>
    %cst_8 = arith.constant dense<0xFF800000> : vector<8xf32>
    %12 = vector.multi_reduction <maximumf>, %11, %cst_8 [1] : vector<8x8xf32> to vector<8xf32>
    %13 = vector.shape_cast %12 : vector<8xf32> to vector<8x1xf32>
    %14 = vector.broadcast %13 : vector<8x1xf32> to vector<8x8xf32>
    %15 = arith.subf %11, %14 : vector<8x8xf32>
    %16 = math.exp %15 : vector<8x8xf32>
    %cst_9 = arith.constant dense<0.000000e+00> : vector<8xf32>
    %17 = vector.multi_reduction <add>, %16, %cst_9 [1] : vector<8x8xf32> to vector<8xf32>
    %18 = vector.shape_cast %17 : vector<8xf32> to vector<8x1xf32>
    %19 = vector.broadcast %18 : vector<8x1xf32> to vector<8x8xf32>
    %20 = arith.divf %16, %19 : vector<8x8xf32>
    %21 = vector.shape_cast %20 : vector<8x8xf32> to vector<8x8x1xf32>
    %22 = vector.broadcast %21 : vector<8x8x1xf32> to vector<8x8x32xf32>
    %23 = arith.mulf %22, %0 : vector<8x8x32xf32>
    %cst_10 = arith.constant dense<0.000000e+00> : vector<8x32xf32>
    %24 = vector.multi_reduction <add>, %23, %cst_10 [1] : vector<8x8x32xf32> to vector<8x32xf32>
    %c0_11 = arith.constant 0 : index
    %c0_12 = arith.constant 0 : index
    %25 = vector.load %arg5[%c0_11, %c0_12] : memref<8x32xf32, #tpu.memory_space<vmem>>, vector<8x32xf32>
    tpu.vector_store %arg5[%c0_11, %c0_12], %24 {strides = array<i32>} : memref<8x32xf32, #tpu.memory_space<vmem>>, vector<8x32xf32>,
    %c0_13 = arith.constant 0 : index
    %c0_14 = arith.constant 0 : index
    %26 = vector.load %arg6[%c0_13, %c0_14] : memref<8x8xf32, #tpu.memory_space<vmem>>, vector<8x8xf32>
    tpu.vector_store %arg6[%c0_13, %c0_14], %20 {strides = array<i32>} : memref<8x8xf32, #tpu.memory_space<vmem>>, vector<8x8xf32>,
    return
  }
  func.func @transform_0(%arg0: i32) -> (i32, i32, i32) {
    %c0_i32 = arith.constant 0 : i32
    %c0_i32_0 = arith.constant 0 : i32
    %c0_i32_1 = arith.constant 0 : i32
    return %arg0, %c0_i32, %c0_i32_0 : i32, i32, i32
  }
  func.func @transform_1(%arg0: i32) -> (i32, i32) {
    %c0_i32 = arith.constant 0 : i32
    %c0_i32_0 = arith.constant 0 : i32
    return %arg0, %c0_i32 : i32, i32
  }
  func.func @transform_2(%arg0: i32) -> (i32, i32) {
    %c0_i32 = arith.constant 0 : i32
    %c0_i32_0 = arith.constant 0 : i32
    %c0_i32_1 = arith.constant 0 : i32
    return %c0_i32, %c0_i32_0 : i32, i32
  }
  func.func @transform_3(%arg0: i32) -> (i32, i32) {
    %c0_i32 = arith.constant 0 : i32
    %c0_i32_0 = arith.constant 0 : i32
    %c0_i32_1 = arith.constant 0 : i32
    return %c0_i32, %c0_i32_0 : i32, i32
  }
  func.func @transform_4(%arg0: i32) -> (i32, i32) {
    %c0_i32 = arith.constant 0 : i32
    %c0_i32_0 = arith.constant 0 : i32
    return %arg0, %c0_i32 : i32, i32
  }
  func.func @transform_5(%arg0: i32) -> (i32, i32) {
    %c0_i32 = arith.constant 0 : i32
    %c0_i32_0 = arith.constant 0 : i32
    return %arg0, %c0_i32 : i32, i32
  }
}

</mosaic_0001>

<bundles_post_ra>
// kernel: tpu_custom_call.1
= control target key start
LH: loop header
LB: loop body
LE: loop exit
PB: predicated region body
PF: predicated region fallthrough
CT: control target
= control target key end

     0   :  { %s1580_s0 = inlined_call_operand.hbm [shape: f32[32,8,32], index: 0, kind: input, shape index: {}]   ;;  %s1581_s1 = inlined_call_operand.vmem [shape: f32[32,8], index: 1, kind: input, shape index: {}]   ;;  %s1582_s2 = inlined_call_operand.vmem [shape: f32[1,32], index: 2, kind: input, shape index: {}]   ;;  %s1583_s3 = inlined_call_operand.<no memory space> [shape: f32[1,1], index: 3, kind: input, shape index: {}]   ;;  %s1584_s4 = inlined_call_operand.hbm [shape: f32[32,32], index: 4, kind: output, shape index: {0}]   ;;  %s1585_s5 = inlined_call_operand.vmem [shape: f32[32,8], index: 5, kind: output, shape index: {1}]  }
   0x1   :  { %v11_v0 = vstv %s1583_s3 }
   0x2   :  { %12 = vst [vmem:[#allocation2] sm:$0x1] %v11_v0 }
   0x3   :  { %13 = vsyncpa [#allocation4], 0 }
   0x4   :  { %15 = vsyncpa [#allocation4 + $0x1], 0 }
   0x5   :  { %16 = vsyncpa [#allocation5], 0 }
   0x6   :  { %18 = vsyncpa [#allocation5 + $0x1], 0  ;;  %s1212_s20 = smov 0   ;;  %s1214_s21 = smov 0  }
   0x7   :  { %s1216_s22 = smov 0   ;;  %s1218_s23 = smov 0  }
   0x8 LB: > { %s1233_s3 = sadd.s32 4294967295, %s1172_s23   ;;  %s978_s24 = sadd.s32 4294967294, %s1172_s23   ;;  %s1172_s23 = sphi %s1218_s23, %s1599_s23   ;;  %s1168_s22 = sphi %s1216_s22, %s1598_s22   ;;  %s1164_s21 = sphi %s1214_s21, %s1597_s21   ;;  %s1160_s20 = sphi %s1212_s20, %s1596_s20  }
   0x9   : > { %s1237_s25 = sadd.s32 1, %s1172_s23   ;;  %s31_s26 = sadd.s32 1, %s1168_s22 }
   0xa   : > { %s28_s27 = ssub.s32 %s1172_s23, %s1237_s25  ;;  %p38_p0 = scmp.ne.s32.totalorder %s1168_s22, %s1164_s21 }
   0xb   : > { %p29_p1 = scmp.eq.s32.totalorder %s28_s27, 0  ;;  %p39_p2 = scmp.eq.s32.totalorder %s1172_s23, 0 }
   0xc   : > { %p44_p3 = scmp.ne.s32.totalorder %s1164_s21, %s1160_s20  ;;  %p45_p4 = scmp.eq.s32.totalorder %s1233_s3, 0 }
   0xd   : > { %s1249_s28 = scalar_select %p29_p1, %s1168_s22, %s31_s26  }
   0xe   : > { %p1251_p5 = por %p39_p2, %p38_p0  ;;  %p1255_p6 = por %p45_p4, %p44_p3 }
   0xf   : > { %p136_p7 = scmp.eq.s32.totalorder %s1233_s3, 3  ;;  %p142_p8 = scmp.eq.s32.totalorder %s978_s24, 3 }
  0x10   : > { %s1589_s30 = scalar_select %p1255_p6, 1, 0 }
  0x11   : > { %p1009_p9 = scmp.lt.s32.totalorder %s1172_s23, 4  ;;  %p1261_p10 = por %p136_p7, %p38_p0 }
  0x12   : > { %p1265_p11 = por %p142_p8, %p44_p3  ;;  %s194_s8 = sand.u32 1, %s1168_s22  }
  0x13   : > { %s1590_s6 = scalar_select %p1261_p10, 1, 0 }
  0x14   : > { %s1591_s7 = scalar_select %p1265_p11, 1, 0 }
  0x15   : > { %s994_s9 = sshll.u32 %s1172_s23, 10  ;;  %s981_s10 = sshll.u32 %s194_s8, 6 }
  0x16   : > { %s1274_s13 = scalar_lea.hbm %s1580_s0, %s994_s9  ;;  %s198_s14 = scalar_lea.vmem [#allocation3], %s981_s10 }
  0x17   : > { %s205_s15 = sshll.u32 %s198_s14, 4  ;;  %p1278_p12 = pnand %p1009_p9, %p1251_p5  ;;  %s1282_s15 = int_to_ptr.vmem [resolvable:$true] %s205_s15 }
  0x18   : > { %s1284_s17 = scalar_lea.sflag [#allocation4], %s194_s8  ;;  %s1080_s18 = scalar_lea.hbm %s1274_s13, 1024 }
  0x19   : > { %p1081_p13 = scmp.ne.s32.totalorder %s1274_s13, %s1080_s18  ;;  %p1082_p0 = pneg %p1278_p12 }
  0x1a   : > { %s1085_s26 = scalar_lea.hbm %s1580_s0, 4096  ;;  %p1086_p3 = scmp.lt.s32.totalorder %s1274_s13, %s1580_s0 }
  0x1b   : > { %p1083_p1 = pnand %p1082_p0, %p1081_p13  ;;  %p1087_p4 = scmp.lt.s32.totalorder %s1085_s26, %s1080_s18 }
  0x1d   : > { %p1084_p2 = pneg %p1083_p1  ;;  %p1088_p5 = por %p1087_p4, %p1086_p3 }
  0x1f   : > { %p1089_p7 = pnand %p1088_p5, %p1084_p2 }
  0x21   : > { %1092 = shalt.err (!%p1089_p7)
}
  0x22   : > { %s1093_s8 = scalar_lea.vmem %s1282_s15, 1024  ;;  %s1174_s9 = smov [#allocation3]  }
  0x23   : > { %p1094_p8 = scmp.ne.s32.totalorder %s1282_s15, %s1093_s8  ;;  %s1098_s10 = sshll.u32 %s1174_s9, 4  ;;  %s1099_s10 = int_to_ptr.vmem [resolvable:$false] %s1098_s10 }
  0x24   : > { %s1100_s11 = scalar_lea.vmem %s1099_s10, 2048  ;;  %p1101_p1 = scmp.lt.s32.totalorder %s1282_s15, %s1099_s10 }
  0x25   : > { %p1096_p9 = pnand %p1094_p8, %p1082_p0  ;;  %p1102_p11 = scmp.lt.s32.totalorder %s1100_s11, %s1093_s8 }
  0x27   : > { %p1097_p13 = pneg %p1096_p9  ;;  %p1103_p10 = por %p1102_p11, %p1101_p1 }
  0x29   : > { %p1104_p6 = pnand %p1103_p10, %p1097_p13 }
  0x2b   : > { %1107 = shalt.err (!%p1104_p6)
}
  0x2c   : > { %s1175_s12 = smov 128   ;;  %s1176_s14 = smov 8  }
  0x2d   : > { %1004 = dma.hbm_to_vmem [thread:$0]  (!%p1278_p12), %s1274_s13, 1024, %s1282_s15, %s1284_s17, %s1175_s12, %s1175_s12, %s1176_s14  }
  0x2e   : > { %p984_p0 = scmp.ge.s32.totalorder %s1172_s23, 1  ;;  %p220_p2 = scmp.lt.s32.totalorder %s1172_s23, 5 }
  0x30   : > { %p221_p3 = pnand %p984_p0, %p220_p2 }
  0x31   : > { %s1308_s18 = sand.u32 (!%p221_p3), 1, %s1164_s21   ;;  %p1593_p6 = scmp.ne.s32.totalorder (!%p221_p3), %s1589_s30, 0 }
  0x32   : > { %224 = sbr.rel (%p221_p3) target bundleno = 1008 (0x3f0), region = 36  ;;  %s985_s19 = sshll.u32 (!%p221_p3), %s1308_s18, 6 }
  0x33   : > { %s227_s24 = scalar_lea.sflag (!%p221_p3), [#allocation4], %s1308_s18  ;;  %s230_s26 = scalar_lea.vmem (!%p221_p3), [#allocation3], %s985_s19 }
  0x37   : > { %1151 = dma.done.wait (%p1593_p6), %s227_s24, 1024  }
  0x38   : > { %1153 = vsyncadd (%p1593_p6), %s227_s24, 4294966272  ;;  %v335_v1 = vlaneseq  ;;  %v1321_v5 = vld [vmem:[%s230_s26 + $0x10] sm:$0xff]  ;;  %v989_v6 = vld [vmem:[%s1582_s2] ss:$0 sm:$0xff]  ;;  %vm297_vm0 = vcmask 261120   ;;  %p266_p10 = scmp.lt.s32.totalorder %s1233_s3, 3 }
  0x39   : > { %v1326_v7 = vld [vmem:[%s230_s26] sm:$0xff]  ;;  %v291_v8 = vmul.f32 %v989_v6, %v1321_v5  ;;  %v1330_v10 = vld [vmem:[%s230_s26 + $0x18] sm:$0xff]  ;;  %v1332_v11 = vld [vmem:[%s230_s26 + $0x8] sm:$0xff]  ;;  %v1177_v36 = vmov 0   ;;  %vm473_vm1 = vcmask 1041409   ;;  %vm475_vm2 = vcmask 1042434  }
  0x3a   : > { %v1316_v2 = vshrl.u32 %v335_v1, 7  ;;  %v440_v3 = vand.u32 127, %v335_v1  ;;  %v289_v9 = vmul.f32 %v989_v6, %v1326_v7  ;;  %v292_v12 = vmul.f32 %v989_v6, %v1330_v10  ;;  %v1336_v14 = vld [vmem:[%s230_s26 + $0x28] sm:$0xff]  ;;  %v1338_v15 = vld [vmem:[%s230_s26 + $0x20] sm:$0xff]  ;;  %v322_v18 = vld [vmem:[#allocation2] sm:$0x1]  ;;  %1047 = vset.pattern.permute.xlu1 %v1177_v36  ;;  %1046 = vset.pattern.permute.xlu0 %v1177_v36 }
  0x3b   : > { %v290_v13 = vmul.f32 %v989_v6, %v1332_v11  ;;  %v304_v16 = vsel %vm297_vm0, %v291_v8, 0.0  ;;  %995 = vpush %v322_v18  ;;  %v294_v21 = vmul.f32 %v989_v6, %v1336_v14  ;;  %v293_v22 = vmul.f32 %v989_v6, %v1338_v15  ;;  %v1346_v23 = vld [vmem:[%s230_s26 + $0x38] sm:$0xff]  ;;  %v1348_v24 = vld [vmem:[%s230_s26 + $0x30] sm:$0xff]  ;;  %s1358_s30 = scalar_select %p266_p10, %s1233_s3, 3 }
  0x3c   : > { %v1319_v4 = vsub.s32 %v440_v3, %v1316_v2  ;;  %v298_v17 = vsel %vm297_vm0, %v289_v9, 0.0  ;;  %305 = vadd.xlane.f32.xlu1 %v304_v16  ;;  %v307_v19 = vsel %vm297_vm0, %v292_v12, 0.0  ;;  %v296_v27 = vmul.f32 %v989_v6, %v1346_v23  ;;  %s986_s12 = sshll.u32 %s1308_s18, 3  ;;  %s991_s14 = sshll.u32 %s1233_s3, 7 }
  0x3d   : > { %299 = vadd.xlane.f32.xlu0 %v298_v17  ;;  %v301_v20 = vsel %vm297_vm0, %v290_v13, 0.0  ;;  %v313_v25 = vsel %vm297_vm0, %v294_v21, 0.0  ;;  %v310_v26 = vsel %vm297_vm0, %v293_v22, 0.0  ;;  %v295_v28 = vmul.f32 %v989_v6, %v1348_v24  ;;  %s987_s16 = sshll.u32 %s1358_s30, 3  ;;  %s258_s19 = scalar_lea.vmem [#allocation6], %s986_s12 }
  0x3e   : > { %v319_v29 = vsel %vm297_vm0, %v296_v27, 0.0  ;;  %s269_s29 = scalar_lea.vmem %s1581_s1, %s987_s16  ;;  %v1367_v31 = vsub.s32 1, %v1316_v2  ;;  %v1371_v34 = vsub.s32 2, %v1316_v2  ;;  %v1374_v35 = vsub.s32 0, %v1316_v2  ;;  %s273_s11 = scalar_lea.vmem %s1585_s5, %s987_s16 }
  0x3f   : > { %v316_v30 = vsel %vm297_vm0, %v295_v28, 0.0  ;;  %v333_v32 = vld [vmem:[%s269_s29] sm:$0xff]  ;;  %v1378_v38 = vsub.s32 3, %v1316_v2  ;;  %v1382_v40 = vsub.s32 4, %v1316_v2  ;;  %v1386_v42 = vsub.s32 5, %v1316_v2  ;;  %s869_s24 = sshll.u32 %s258_s19, 4  ;;  %s1542_s15 = scalar_lea.hbm %s1584_s4, %s991_s14  ;;  %s870_s24 = int_to_ptr.vmem [resolvable:$true] %s869_s24 }
  0x40   : > { %308 = vadd.xlane.f32.xlu1 %v307_v19  ;;  %v345_v33 = vrot.slane %v333_v32, %v1367_v31  ;;  %v352_v37 = vrot.slane %v333_v32, %v1371_v34  ;;  %v338_v39 = vrot.slane %v333_v32, %v1374_v35  ;;  %v1390_v44 = vsub.s32 6, %v1316_v2  ;;  %s852_s3 = scalar_lea.sflag [#allocation5], %s1308_s18  ;;  %s1108_s30 = scalar_lea.vmem %s870_s24, 128 }
  0x41   : > { %302 = vadd.xlane.f32.xlu0 %v301_v20  ;;  %v359_v41 = vrot.slane %v333_v32, %v1378_v38  ;;  %v366_v43 = vrot.slane %v333_v32, %v1382_v40  ;;  %v373_v45 = vrot.slane %v333_v32, %v1386_v42  ;;  %v1394_v46 = vsub.s32 7, %v1316_v2  ;;  %p1109_p11 = scmp.ne.s32.totalorder %s870_s24, %s1108_s30  ;;  %p1594_p12 = scmp.ne.s32.totalorder %s1590_s6, 0 }
  0x42   : > { %v380_v47 = vrot.slane %v333_v32, %v1390_v44  ;;  %vm477_vm3 = vcmask 1043459   ;;  %vm479_vm4 = vcmask 1044484   ;;  %vm481_vm5 = vcmask 1045509   ;;  %s1178_s16 = smov [#allocation6]  }
  0x43   : > { %v387_v48 = vrot.slane %v333_v32, %v1394_v46  ;;  %vm483_vm6 = vcmask 1046534   ;;  %vm485_vm7 = vcmask 1047559   ;;  %vm488_vm8 = vcmask 64512   ;;  %p1110_p4 = pnand %p1109_p11, %p1594_p12  ;;  %s1112_s17 = sshll.u32 %s1178_s16, 4  ;;  %s1113_s17 = int_to_ptr.vmem [resolvable:$false] %s1112_s17 }
  0x44   : > { %314 = vadd.xlane.f32.xlu1 %v313_v25  ;;  %s1114_s27 = scalar_lea.vmem %s1113_s17, 256  ;;  %p1115_p7 = scmp.lt.s32.totalorder %s870_s24, %s1113_s17 }
  0x45   : > { %311 = vadd.xlane.f32.xlu0 %v310_v26  ;;  %p1111_p5 = pneg %p1110_p4  ;;  %p1116_p8 = scmp.lt.s32.totalorder %s1114_s27, %s1108_s30 }
  0x47   : > { %p1117_p9 = por %p1116_p8, %p1115_p7 }
  0x48   : > { %320 = vadd.xlane.f32.xlu1 %v319_v29 }
  0x49   : > { %317 = vadd.xlane.f32.xlu0 %v316_v30  ;;  %p1118_p13 = pnand %p1117_p9, %p1111_p5 }
  0x59   : > { %347 = vbcast.lane.b32.xlu1 %v345_v33, 256 }
  0x5d   : > { %354 = vbcast.lane.b32.xlu1 %v352_v37, 256 }
  0x5f   : > { %340 = vbcast.lane.b32.xlu0 %v338_v39, 256 }
  0x61   : > { %361 = vbcast.lane.b32.xlu1 %v359_v41, 256 }
  0x63   : > { %368 = vbcast.lane.b32.xlu0 %v366_v43, 256 }
  0x65   : > { %375 = vbcast.lane.b32.xlu1 %v373_v45, 256 }
  0x67   : > { %382 = vbcast.lane.b32.xlu0 %v380_v47, 256 }
  0x69   : > { %389 = vbcast.lane.b32.xlu1 %v387_v48, 256 }
  0x6c   : > { %s996_s8 = spop %995 }
  0x6d   : > { %v324_v57 = vstv %s996_s8 }
  0xc5   : > { %v306_v49 = vpop.xlane.xlu1 %305 }
  0xc6   : > { %v300_v50 = vpop.xlane.xlu0 %299  ;;  %v327_v0 = vadd.f32 %v324_v57, %v306_v49 }
  0xc7   : > { %v325_v58 = vadd.f32 %v324_v57, %v300_v50 }
  0xc9   : > { %v309_v51 = vpop.xlane.xlu1 %308 }
  0xca   : > { %v303_v52 = vpop.xlane.xlu0 %302  ;;  %v328_v6 = vadd.f32 %v324_v57, %v309_v51 }
  0xcb   : > { %v326_v59 = vadd.f32 %v324_v57, %v303_v52 }
  0xcd   : > { %v315_v53 = vpop.xlane.xlu1 %314 }
  0xce   : > { %v312_v54 = vpop.xlane.xlu0 %311  ;;  %v330_v17 = vadd.f32 %v324_v57, %v315_v53 }
  0xcf   : > { %v329_v8 = vadd.f32 %v324_v57, %v312_v54 }
  0xd1   : > { %v321_v55 = vpop.xlane.xlu1 %320 }
  0xd2   : > { %v318_v56 = vpop.xlane.xlu0 %317  ;;  %v332_v22 = vadd.f32 %v324_v57, %v321_v55 }
  0xd3   : > { %v331_v18 = vadd.f32 %v324_v57, %v318_v56 }
  0xd5   : > { %v348_v60 = vpop.permute.xlu1 %347 }
  0xd6   : > { %v341_v61 = vpop.permute.xlu0 %340  ;;  %v1398_v62 = vadd.f32 %v348_v60, %v326_v59 }
  0xd7   : > { %v1400_v63 = vadd.f32 %v341_v61, %v325_v58 }
  0xd8   : > { %419 = vperm.xlu1 %1047, %v1398_v62  }
  0xd9   : > { %416 = vperm.xlu0 %1046, %v1400_v63   ;;  %v355_v1 = vpop.permute.xlu1 %354 }
  0xda   : > { %v369_v2 = vpop.permute.xlu0 %368  ;;  %v401_v3 = vadd.f32 %v355_v1, %v327_v0 }
  0xdb   : > { %v1404_v12 = vadd.f32 %v369_v2, %v329_v8 }
  0xdc   : > { %422 = vperm.xlu1 %1047, %v401_v3  }
  0xdd   : > { %v362_v9 = vpop.permute.xlu1 %361 }
  0xde   : > { %v402_v13 = vadd.f32 %v362_v9, %v328_v6  ;;  %v383_v16 = vpop.permute.xlu0 %382 }
  0xdf   : > { %v1407_v20 = vadd.f32 %v383_v16, %v331_v18 }
  0xe0   : > { %425 = vperm.xlu0 %1046, %v402_v13   ;;  %428 = vperm.xlu1 %1047, %v1404_v12  }
  0xe1   : > { %v376_v19 = vpop.permute.xlu1 %375 }
  0xe2   : > { %v404_v21 = vadd.f32 %v376_v19, %v330_v17 }
  0xe4   : > { %431 = vperm.xlu0 %1046, %v404_v21   ;;  %434 = vperm.xlu1 %1047, %v1407_v20  }
  0xe5   : > { %v390_v25 = vpop.permute.xlu1 %389 }
  0xe6   : > { %v1410_v26 = vadd.f32 %v390_v25, %v332_v22 }
  0xe8   : > { %437 = vperm.xlu0 %1046, %v1410_v26  }
 0x153   : > { %v420_v27 = vpop.permute.xlu1 %419 }
 0x154   : > { %v417_v28 = vpop.permute.xlu0 %416  ;;  %v448_v30 = vrot.slane %v420_v27, %v1319_v4 }
 0x155   : > { %v444_v32 = vrot.slane %v417_v28, %v1319_v4 }
 0x157   : > { %v423_v29 = vpop.permute.xlu1 %422  ;;  %v474_v39 = vsel %vm473_vm1, %v448_v30, %v444_v32 }
 0x158   : > { %v452_v33 = vrot.slane %v423_v29, %v1319_v4 }
 0x15a   : > { %v476_v43 = vsel %vm475_vm2, %v452_v33, %v474_v39 }
 0x15b   : > { %v429_v36 = vpop.permute.xlu1 %428  ;;  %v426_v37 = vpop.permute.xlu0 %425 }
 0x15c   : > { %v456_v41 = vrot.slane %v426_v37, %v1319_v4  ;;  %v460_v45 = vrot.slane %v429_v36, %v1319_v4 }
 0x15e   : > { %v478_v47 = vsel %vm477_vm3, %v456_v41, %v476_v43 }
 0x15f   : > { %v435_v48 = vpop.permute.xlu1 %434  ;;  %v432_v49 = vpop.permute.xlu0 %431  ;;  %v480_v52 = vsel %vm479_vm4, %v460_v45, %v478_v47 }
 0x160   : > { %v464_v50 = vrot.slane %v432_v49, %v1319_v4  ;;  %v468_v51 = vrot.slane %v435_v48, %v1319_v4 }
 0x162   : > { %v482_v53 = vsel %vm481_vm5, %v464_v50, %v480_v52 }
 0x163   : > { %v438_v54 = vpop.permute.xlu0 %437  ;;  %v484_v56 = vsel %vm483_vm6, %v468_v51, %v482_v53 }
 0x164   : > { %v472_v55 = vrot.slane %v438_v54, %v1319_v4 }
 0x166   : > { %v486_v57 = vsel %vm485_vm7, %v472_v55, %v484_v56 }
 0x167   : > { %v489_v58 = vsel %vm488_vm8, %v486_v57, -inf }
 0x168   : > { %490 = vmax.xlane.f32.xlu1 %v489_v58 }
 0x1f1   : > { %v491_v59 = vpop.xlane.xlu1 %490 }
 0x1f2   : > { %v496_v60 = vrot.slane %v491_v59, %v1374_v35  ;;  %v500_v61 = vrot.slane %v491_v59, %v1367_v31  ;;  %v504_v0 = vrot.slane %v491_v59, %v1371_v34  ;;  %v508_v8 = vrot.slane %v491_v59, %v1378_v38 }
 0x1f3   : > { %v512_v17 = vrot.slane %v491_v59, %v1382_v40  ;;  %v516_v22 = vrot.slane %v491_v59, %v1386_v42 }
 0x1f4   : > { %v533_v1 = vsub.f32 %v1400_v63, %v496_v60  ;;  %v534_v2 = vsub.f32 %v1398_v62, %v500_v61  ;;  %v535_v9 = vsub.f32 %v401_v3, %v504_v0  ;;  %v536_v18 = vsub.f32 %v402_v13, %v508_v8 }
 0x1f5   : > { %v537_v25 = vsub.f32 %v1404_v12, %v512_v17  ;;  %v520_v63 = vrot.slane %v491_v59, %v1390_v44  ;;  %v538_v62 = vsub.f32 %v404_v21, %v516_v22  ;;  %v524_v3 = vrot.slane %v491_v59, %v1394_v46 }
 0x1f6   : > { %v541_v6 = vmul.f32 1.442695, %v533_v1  ;;  %v543_v16 = vmul.f32 1.442695, %v534_v2  ;;  %v545_v19 = vmul.f32 1.442695, %v535_v9 }
 0x1f7   : > { %v547_v27 = vmul.f32 1.442695, %v536_v18  ;;  %v549_v28 = vmul.f32 1.442695, %v537_v25  ;;  %v539_v13 = vsub.f32 %v1407_v20, %v520_v63  ;;  %v551_v30 = vmul.f32 1.442695, %v538_v62 }
 0x1f8   : > { %1048 = vpow2.f32 %v541_v6  ;;  %v540_v12 = vsub.f32 %v1410_v26, %v524_v3 }
 0x1f9   : > { %1050 = vpow2.f32 %v543_v16  ;;  %v553_v21 = vmul.f32 1.442695, %v539_v13 }
 0x1fa   : > { %1052 = vpow2.f32 %v545_v19  ;;  %v555_v36 = vmul.f32 1.442695, %v540_v12 }
 0x1fb   : > { %1054 = vpow2.f32 %v547_v27 }
 0x1fc   : > { %1056 = vpow2.f32 %v549_v28 }
 0x1fd   : > { %1058 = vpow2.f32 %v551_v30 }
 0x1fe   : > { %1060 = vpow2.f32 %v553_v21 }
 0x1ff   : > { %1062 = vpow2.f32 %v555_v36 }
 0x205   : > { %v1439_v29 = vpop.eup %1048 }
 0x206   : > { %566 = vperm.xlu0 %1046, %v1439_v29   ;;  %v1444_v32 = vpop.eup %1050 }
 0x207   : > { %v1448_v33 = vpop.eup %1052 }
 0x208   : > { %v1451_v37 = vpop.eup %1054 }
 0x209   : > { %v1057_v20 = vpop.eup %1056 }
 0x20a   : > { %569 = vperm.xlu0 %1046, %v1444_v32   ;;  %v1454_v39 = vpop.eup %1058 }
 0x20b   : > { %v1457_v26 = vpop.eup %1060 }
 0x20c   : > { %v1460_v41 = vpop.eup %1062 }
 0x20e   : > { %572 = vperm.xlu0 %1046, %v1448_v33  }
 0x212   : > { %575 = vperm.xlu0 %1046, %v1451_v37  }
 0x216   : > { %578 = vperm.xlu0 %1046, %v1057_v20  }
 0x21a   : > { %581 = vperm.xlu0 %1046, %v1454_v39  }
 0x21e   : > { %584 = vperm.xlu0 %1046, %v1457_v26  }
 0x222   : > { %587 = vperm.xlu0 %1046, %v1460_v41  }
 0x281   : > { %v567_v43 = vpop.permute.xlu0 %566 }
 0x282   : > { %v592_v53 = vrot.slane %v567_v43, %v1319_v4 }
 0x285   : > { %v570_v45 = vpop.permute.xlu0 %569 }
 0x286   : > { %v596_v51 = vrot.slane %v570_v45, %v1319_v4 }
 0x288   : > { %v621_v57 = vsel %vm473_vm1, %v596_v51, %v592_v53 }
 0x289   : > { %v573_v47 = vpop.permute.xlu0 %572 }
 0x28a   : > { %v600_v52 = vrot.slane %v573_v47, %v1319_v4 }
 0x28c   : > { %v622_v59 = vsel %vm475_vm2, %v600_v52, %v621_v57 }
 0x28d   : > { %v576_v48 = vpop.permute.xlu0 %575 }
 0x28e   : > { %v604_v54 = vrot.slane %v576_v48, %v1319_v4 }
 0x290   : > { %v623_v61 = vsel %vm477_vm3, %v604_v54, %v622_v59 }
 0x291   : > { %v579_v49 = vpop.permute.xlu0 %578 }
 0x292   : > { %v608_v55 = vrot.slane %v579_v49, %v1319_v4 }
 0x294   : > { %v624_v0 = vsel %vm479_vm4, %v608_v55, %v623_v61 }
 0x295   : > { %v582_v50 = vpop.permute.xlu0 %581 }
 0x296   : > { %v612_v58 = vrot.slane %v582_v50, %v1319_v4 }
 0x298   : > { %v625_v2 = vsel %vm481_vm5, %v612_v58, %v624_v0 }
 0x299   : > { %v585_v56 = vpop.permute.xlu0 %584 }
 0x29a   : > { %v616_v60 = vrot.slane %v585_v56, %v1319_v4 }
 0x29c   : > { %v626_v8 = vsel %vm483_vm6, %v616_v60, %v625_v2 }
 0x29d   : > { %v588_v1 = vpop.permute.xlu0 %587 }
 0x29e   : > { %v620_v6 = vrot.slane %v588_v1, %v1319_v4 }
 0x2a0   : > { %v627_v9 = vsel %vm485_vm7, %v620_v6, %v626_v8 }
 0x2a1   : > { %v629_v16 = vsel %vm488_vm8, %v627_v9, 0.0 }
 0x2a2   : > { %630 = vadd.xlane.f32.xlu0 %v629_v16 }
 0x32b   : > { %v631_v17 = vpop.xlane.xlu0 %630 }
 0x32c   : > { %v652_v18 = vrot.slane %v631_v17, %v1382_v40  ;;  %v636_v19 = vrot.slane %v631_v17, %v1374_v35  ;;  %v640_v22 = vrot.slane %v631_v17, %v1367_v31  ;;  %v644_v25 = vrot.slane %v631_v17, %v1371_v34 }
 0x32d   : > { %v648_v27 = vrot.slane %v631_v17, %v1378_v38  ;;  %v656_v63 = vrot.slane %v631_v17, %v1386_v42  ;;  %v660_v35 = vrot.slane %v631_v17, %v1390_v44  ;;  %v664_v34 = vrot.slane %v631_v17, %v1394_v46 }
 0x32e   : > { %1064 = vrcp.f32 %v652_v18 }
 0x32f   : > { %1066 = vrcp.f32 %v636_v19 }
 0x330   : > { %1068 = vrcp.f32 %v640_v22 }
 0x331   : > { %1070 = vrcp.f32 %v644_v25 }
 0x332   : > { %1072 = vrcp.f32 %v648_v27 }
 0x333   : > { %1074 = vrcp.f32 %v656_v63 }
 0x334   : > { %1076 = vrcp.f32 %v660_v35 }
 0x335   : > { %1078 = vrcp.f32 %v664_v34 }
 0x33b   : > { %v1065_v62 = vpop.eup %1064 }
 0x33c   : > { %v1067_v28 = vpop.eup %1066  ;;  %v682_v3 = vmul.f32 %v1065_v62, %v1057_v20 }
 0x33d   : > { %v674_v40 = vmul.f32 %v1067_v28, %v1439_v29  ;;  %v1069_v31 = vpop.eup %1068 }
 0x33e   : > { %711 = vperm.xlu0 %1046, %v682_v3   ;;  %v676_v13 = vmul.f32 %v1069_v31, %v1444_v32  ;;  %v1071_v38 = vpop.eup %1070 }
 0x33f   : > { %691 = vperm.xlu1 %1047, %v674_v40   ;;  %v678_v42 = vmul.f32 %v1071_v38, %v1448_v33  ;;  %v1073_v30 = vpop.eup %1072 }
 0x340   : > { %v680_v29 = vmul.f32 %v1073_v30, %v1451_v37  ;;  %v1075_v12 = vpop.eup %1074 }
 0x341   : > { %v684_v44 = vmul.f32 %v1075_v12, %v1454_v39  ;;  %v1077_v21 = vpop.eup %1076 }
 0x342   : > { %v686_v32 = vmul.f32 %v1077_v21, %v1457_v26  ;;  %v1079_v36 = vpop.eup %1078 }
 0x343   : > { %696 = vperm.xlu1 %1047, %v676_v13   ;;  %v688_v46 = vmul.f32 %v1079_v36, %v1460_v41 }
 0x347   : > { %701 = vperm.xlu1 %1047, %v678_v42  }
 0x34b   : > { %706 = vperm.xlu1 %1047, %v680_v29  }
 0x34f   : > { %716 = vperm.xlu1 %1047, %v684_v44  }
 0x353   : > { %721 = vperm.xlu1 %1047, %v686_v32  }
 0x357   : > { %726 = vperm.xlu1 %1047, %v688_v46  }
 0x3b9   : > { %v712_v37 = vpop.permute.xlu0 %711 }
 0x3ba   : > { %v692_v20 = vpop.permute.xlu1 %691  ;;  %v733_v49 = vmul.f32 %v712_v37, %v1338_v15  ;;  %v829_v40 = vrot.slane %v712_v37, %v1319_v4 }
 0x3bb   : > { %v729_v33 = vmul.f32 %v692_v20, %v1326_v7  ;;  %v813_v1 = vrot.slane %v692_v20, %v1319_v4 }
 0x3bc   : > { %v765_v7 = vsel %vm297_vm0, %v733_v49, 0.0 }
 0x3bd   : > { %v737_v43 = vsel %vm297_vm0, %v729_v33, 0.0  ;;  %v766_v57 = vrot.slane %v765_v7, 4 }
 0x3be   : > { %v697_v45 = vpop.permute.xlu1 %696  ;;  %v738_v48 = vrot.slane %v737_v43, 4 }
 0x3bf   : > { %v730_v47 = vmul.f32 %v697_v45, %v1332_v11  ;;  %v817_v59 = vrot.slane %v697_v45, %v1319_v4  ;;  %v767_v9 = vadd.f32 %v766_v57, %v765_v7 }
 0x3c0   : > { %v739_v41 = vadd.f32 %v738_v48, %v737_v43 }
 0x3c1   : > { %v744_v39 = vsel %vm297_vm0, %v730_v47, 0.0  ;;  %v842_v17 = vsel %vm473_vm1, %v817_v59, %v813_v1  ;;  %v768_v34 = vrot.slane %v767_v9, 2 }
 0x3c2   : > { %v745_v26 = vrot.slane %v744_v39, 4  ;;  %v702_v50 = vpop.permute.xlu1 %701  ;;  %v740_v58 = vrot.slane %v739_v41, 2 }
 0x3c3   : > { %v731_v51 = vmul.f32 %v702_v50, %v1321_v5  ;;  %v821_v5 = vrot.slane %v702_v50, %v1319_v4  ;;  %v769_v37 = vadd.f32 %v768_v34, %v767_v9 }
 0x3c4   : > { %v746_v53 = vadd.f32 %v745_v26, %v744_v39  ;;  %v741_v16 = vadd.f32 %v740_v58, %v739_v41 }
 0x3c5   : > { %v751_v52 = vsel %vm297_vm0, %v731_v51, 0.0  ;;  %v843_v22 = vsel %vm475_vm2, %v821_v5, %v842_v17  ;;  %v770_v7 = vrot.slane %v769_v37, 1 }
 0x3c6   : > { %v752_v54 = vrot.slane %v751_v52, 4  ;;  %v707_v55 = vpop.permute.xlu1 %706  ;;  %v747_v60 = vrot.slane %v746_v53, 2  ;;  %v742_v38 = vrot.slane %v741_v16, 1 }
 0x3c7   : > { %v732_v56 = vmul.f32 %v707_v55, %v1330_v10  ;;  %v825_v6 = vrot.slane %v707_v55, %v1319_v4  ;;  %v771_v59 = vadd.f32 %v770_v7, %v769_v37 }
 0x3c8   : > { %v753_v11 = vadd.f32 %v752_v54, %v751_v52  ;;  %v748_v19 = vadd.f32 %v747_v60, %v746_v53  ;;  %v743_v50 = vadd.f32 %v742_v38, %v741_v16 }
 0x3c9   : > { %v758_v15 = vsel %vm297_vm0, %v732_v56, 0.0  ;;  %v844_v28 = vsel %vm477_vm3, %v825_v6, %v843_v22 }
 0x3ca   : > { %v759_v61 = vrot.slane %v758_v15, 4  ;;  %v717_v0 = vpop.permute.xlu1 %716  ;;  %v754_v2 = vrot.slane %v753_v11, 2  ;;  %v749_v30 = vrot.slane %v748_v19, 1  ;;  %v845_v29 = vsel %vm479_vm4, %v829_v40, %v844_v28 }
 0x3cb   : > { %v734_v8 = vmul.f32 %v717_v0, %v1336_v14  ;;  %v833_v3 = vrot.slane %v717_v0, %v1319_v4 }
 0x3cc   : > { %v760_v10 = vadd.f32 %v759_v61, %v758_v15  ;;  %v755_v62 = vadd.f32 %v754_v2, %v753_v11  ;;  %v750_v39 = vadd.f32 %v749_v30, %v748_v19 }
 0x3cd   : > { %v772_v18 = vsel %vm297_vm0, %v734_v8, 0.0  ;;  %v846_v36 = vsel %vm481_vm5, %v833_v3, %v845_v29 }
 0x3ce   : > { %v761_v25 = vrot.slane %v760_v10, 2  ;;  %v773_v27 = vrot.slane %v772_v18, 4  ;;  %v722_v63 = vpop.permute.xlu1 %721  ;;  %v756_v32 = vrot.slane %v755_v62, 1  ;;  %v801_v53 = vsel %vm473_vm1, %v750_v39, %v743_v50 }
 0x3cf   : > { %v735_v14 = vmul.f32 %v722_v63, %v1348_v24  ;;  %v837_v13 = vrot.slane %v722_v63, %v1319_v4 }
 0x3d0   : > { %v762_v35 = vadd.f32 %v761_v25, %v760_v10  ;;  %v774_v31 = vadd.f32 %v773_v27, %v772_v18 }
 0x3d1   : > { %v779_v42 = vsel %vm297_vm0, %v735_v14, 0.0  ;;  %v847_v45 = vsel %vm483_vm6, %v837_v13, %v846_v36 }
 0x3d2   : > { %v775_v12 = vrot.slane %v774_v31, 2  ;;  %v780_v44 = vrot.slane %v779_v42, 4  ;;  %v727_v21 = vpop.permute.xlu1 %726  ;;  %v763_v20 = vrot.slane %v762_v35, 1 }
 0x3d3   : > { %v736_v24 = vmul.f32 %v727_v21, %v1346_v23  ;;  %v841_v46 = vrot.slane %v727_v21, %v1319_v4  ;;  %v757_v23 = vadd.f32 %v756_v32, %v755_v62 }
 0x3d4   : > { %v776_v33 = vadd.f32 %v775_v12, %v774_v31  ;;  %v781_v43 = vadd.f32 %v780_v44, %v779_v42  ;;  %v764_v51 = vadd.f32 %v763_v20, %v762_v35 }
 0x3d5   : > { %v786_v47 = vsel %vm297_vm0, %v736_v24, 0.0  ;;  %v848_v48 = vsel %vm485_vm7, %v841_v46, %v847_v45  ;;  %v802_v56 = vsel %vm475_vm2, %v757_v23, %v801_v53 }
 0x3d6   : > { %v782_v49 = vrot.slane %v781_v43, 2  ;;  %v787_v26 = vrot.slane %v786_v47, 4  ;;  %850 = vst.msk [vmem:[%s273_s11] sm:$0xff] %vm488_vm8, %v848_v48  ;;  %v777_v4 = vrot.slane %v776_v33, 1  ;;  %v803_v11 = vsel %vm477_vm3, %v764_v51, %v802_v56 }
 0x3d7   : > { %v804_v5 = vsel %vm479_vm4, %v771_v59, %v803_v11 }
 0x3d8   : > { %v783_v41 = vadd.f32 %v782_v49, %v781_v43  ;;  %v788_v52 = vadd.f32 %v787_v26, %v786_v47  ;;  %v778_v57 = vadd.f32 %v777_v4, %v776_v33 }
 0x3da   : > { %v784_v54 = vrot.slane %v783_v41, 1  ;;  %v789_v55 = vrot.slane %v788_v52, 2  ;;  %v805_v61 = vsel %vm481_vm5, %v778_v57, %v804_v5 }
 0x3dc   : > { %v790_v58 = vadd.f32 %v789_v55, %v788_v52  ;;  %v785_v15 = vadd.f32 %v784_v54, %v783_v41 }
 0x3de   : > { %v791_v60 = vrot.slane %v790_v58, 1  ;;  %v806_v1 = vsel %vm483_vm6, %v785_v15, %v805_v61 }
 0x3e0   : > { %v792_v0 = vadd.f32 %v791_v60, %v790_v58 }
 0x3e2   : > { %v807_v2 = vsel %vm485_vm7, %v792_v0, %v806_v1 }
 0x3e3   : > { %809 = vst.msk [vmem:[%s258_s19] sm:$0xff] %vm297_vm0, %v807_v2 }
 0x3e4   : > { %1121 = shalt.err (!%p1118_p13)
}
 0x3e5   : > { %s1122_s29 = scalar_lea.hbm %s1542_s15, 128  ;;  %s1126_s9 = scalar_lea.hbm %s1584_s4, 512 }
 0x3e6   : > { %p1123_p1 = scmp.ne.s32.totalorder %s1542_s15, %s1122_s29  ;;  %p1127_p3 = scmp.lt.s32.totalorder %s1542_s15, %s1584_s4 }
 0x3e7   : > { %p1128_p6 = scmp.lt.s32.totalorder %s1126_s9, %s1122_s29 }
 0x3e8   : > { %p1124_p0 = pnand %p1123_p1, %p1594_p12 }
 0x3e9   : > { %p1129_p10 = por %p1128_p6, %p1127_p3 }
 0x3ea   : > { %p1125_p2 = pneg %p1124_p0 }
 0x3ec   : > { %p1130_p11 = pnand %p1129_p10, %p1125_p2 }
 0x3ee   : > { %1133 = shalt.err (!%p1130_p11)
}
 0x3ef   : > { %999 = dma.vmem_to_hbm [thread:$0]  (%p1594_p12), %s870_s24, 128, %s1542_s15, %s852_s3  }
 0x3f0 PF: > { %p1010_p4 = scmp.ge.s32.totalorder %s1172_s23, 2  ;;  %s884_s12 = sand.u32 1, %s1160_s20  }
 0x3f1   : > { %p1595_p5 = scmp.ne.s32.totalorder %s1591_s7, 0  ;;  %s885_s14 = scalar_lea.sflag [#allocation5], %s884_s12 }
 0x3f3   : > { %p1006_p7 = pnand %p1010_p4, %p1595_p5 }
 0x3f5   : > { %p1007_p8 = pneg %p1006_p7 }
 0x3f7   : > { %1155 = dma.done.wait (%p1007_p8), %s885_s14, 128  }
 0x3f8   : > { %1157 = vsyncadd (%p1007_p8), %s885_s14, 4294967168  ;;  %p21_p9 = scmp.ge.s32.totalorder %s1237_s25, 6   ;;  %s1596_s20 = smov %s1164_s21 }
 0x3f9   : > { %s1597_s21 = smov %s1168_s22  ;;  %s1598_s22 = smov %s1249_s28 }
 0x3fa   : > { %s1599_s23 = smov %s1237_s25  ;;  %23 = sbr.rel (!%p21_p9) target bundleno = 8 (0x8), region = 96 }
 0x3ff   :  { %897 = vsyncpa [#allocation4], 1 }
 0x400   :  { %899 = vsyncpa [#allocation4 + $0x1], 1 }
 0x401   :  { %900 = vsyncpa [#allocation5], 1 }
 0x402   :  { %902 = vsyncpa [#allocation5 + $0x1], 1 }

</bundles_post_ra>
